<compile_context>
chip_gen: v7x
topology: tpu7x:2x2x1
jax: 0.10.0
libtpu: 0.0.40
codegen_flags: <defaults>
</compile_context>

<pallas_src>
import math

import jax
import jax.numpy as jnp
from jax import lax
from jax.experimental import pallas as pl
from jax.experimental.pallas import tpu as pltpu


def _decoder_kernel(
    # per-batch-block inputs
    x0_ref, h0_ref, c0_ref, ctx_ref, emb_ref,
    # resident weights (constant index_map -> DMAed once, stay in VMEM)
    w_ih_ref, w_hh_ref, b_g_ref,
    w_inp_ref, b_inp_ref, v_ref,
    w_out_hs_ref, w_out_ht_ref, b_out_ref,
    # outputs
    alpha_ref, h_fin_ref, c_fin_ref,
    # VMEM carries (persist across the decode-step grid axis)
    h_sc, c_sc, m_sc, x_sc,
):
    f32 = jnp.float32
    bf16 = jnp.bfloat16

    t = pl.program_id(1)
    n_steps = pl.num_programs(1)

    @pl.when(t == 0)
    def _init():
        h_sc[...] = h0_ref[...]
        c_sc[...] = c0_ref[...]
        x_sc[...] = x0_ref[...]
        m_sc[...] = jnp.ones_like(m_sc)

    x = x_sc[...]                         # (Bb, Din) f32
    h = h_sc[...]                         # (Bb, H)   f32
    c = c_sc[...]                         # (Bb, H)   f32
    mask = m_sc[...]                      # (Bb, S)   1.0 = selectable, 0.0 = picked
    ctx = ctx_ref[...].astype(f32)        # (Bb, S, H) precomputed context_linear(context)
    Bb, S, H = ctx.shape

    # -------- LSTM cell: two fused MXU pushes, gate slices of (Bb, 4H) --------
    gates = (jnp.dot(x.astype(bf16), w_ih_ref[...], preferred_element_type=f32)
             + jnp.dot(h.astype(bf16), w_hh_ref[...], preferred_element_type=f32)
             + b_g_ref[...])                                           # (Bb, 4H) f32
    i_g = jax.nn.sigmoid(gates[:, 0 * H:1 * H])
    f_g = jax.nn.sigmoid(gates[:, 1 * H:2 * H])
    g_g = jnp.tanh(gates[:, 2 * H:3 * H])
    o_g = jax.nn.sigmoid(gates[:, 3 * H:4 * H])
    c_t = f_g * c + i_g * g_g
    h_t = o_g * jnp.tanh(c_t)                                          # (Bb, H) f32

    # -------- Attention --------
    inp = (jnp.dot(h_t.astype(bf16), w_inp_ref[...], preferred_element_type=f32)
           + b_inp_ref[...])                                           # (Bb, H)
    tt = jnp.tanh(inp[:, None, :] + ctx)                               # (Bb, S, H) f32
    att = jnp.sum(tt * v_ref[...][None, :, :], axis=-1)                # (Bb, S)

    # att[mask == 0] = -inf  (NOTE: if every position were masked this produces
    # NaN, matching the reference softmax-of-all(-inf) behaviour; n_steps <= S.)
    att = jnp.where(mask > 0.0, att, jnp.float32(-jnp.inf))
    att_max = jnp.max(att, axis=1, keepdims=True)
    e = jnp.exp(att - att_max)
    denom = jnp.sum(e, axis=1, keepdims=True)
    alpha = e * pl.reciprocal(denom, approx=True)                      # softmax over S

    # hidden_state[b,h] = sum_s alpha[b,s] * ctx[b,s,h]  — VPU mul + reduce over S
    # (avoids B separate M=1 MXU matmuls; VPU/XLU have slack here).
    hidden_state = jnp.sum(alpha[:, :, None] * ctx, axis=1)            # (Bb, H)

    # hidden_out(cat(hidden_state, h_t)) with the concat split into two matmuls
    hid_t = jnp.tanh(
        jnp.dot(hidden_state.astype(bf16), w_out_hs_ref[...],
                preferred_element_type=f32)
        + jnp.dot(h_t.astype(bf16), w_out_ht_ref[...],
                  preferred_element_type=f32)
        + b_out_ref[...])                                              # (Bb, H)

    # -------- pointer / mask update / next-input gather --------
    # Masked positions have alpha == 0 exactly (exp(-inf)), so no extra
    # alpha*mask multiply is needed before the argmax.
    max_v = jnp.max(alpha, axis=1, keepdims=True)
    iota = lax.broadcasted_iota(jnp.int32, (Bb, S), 1)
    idx = jnp.min(jnp.where(alpha == max_v, iota, S), axis=1)          # first argmax, (Bb,)
    one_hot = (iota == idx[:, None]).astype(f32)                       # (Bb, S)
    x_next = jnp.sum(one_hot[:, :, None] * emb_ref[...].astype(f32),
                     axis=1)                                           # (Bb, Din)

    # -------- outputs + carry updates --------
    # alpha block is resident over the step axis: this is a VMEM store only;
    # HBM writeback happens once per batch block.
    alpha_ref[t] = alpha
    h_sc[...] = hid_t
    c_sc[...] = c_t
    m_sc[...] = mask * (1.0 - one_hot)
    x_sc[...] = x_next

    @pl.when(t == n_steps - 1)
    def _finalize():
        h_fin_ref[...] = hid_t
        c_fin_ref[...] = c_t


def _build_decoder_call(n_steps, B, S, Din, H, batch_block=None):
    f32 = jnp.float32
    Bb = B if batch_block is None else batch_block
    assert B % Bb == 0
    nb = B // Bb

    def batched(shape):
        nd = len(shape)
        return pl.BlockSpec(shape, lambda b, t, _n=nd: (b,) + (0,) * (_n - 1))

    def resident(shape):
        nd = len(shape)
        return pl.BlockSpec(shape, lambda b, t, _n=nd: (0,) * _n)

    in_specs = [
        batched((Bb, Din)),         # decoder_input_init
        batched((Bb, H)),           # h0
        batched((Bb, H)),           # c0
        batched((Bb, S, H)),        # precomputed ctx projection (bf16)
        batched((Bb, S, Din)),      # embedded_inputs (bf16)
        resident((Din, 4 * H)),     # w_ih (bf16)
        resident((H, 4 * H)),       # w_hh (bf16)
        resident((1, 4 * H)),       # combined gate bias (f32)
        resident((H, H)),           # attention input_linear W (bf16)
        resident((1, H)),           # attention input_linear b
        resident((1, H)),           # attention V
        resident((H, H)),           # hidden_out W (hidden_state half, bf16)
        resident((H, H)),           # hidden_out W (h_t half, bf16)
        resident((1, H)),           # hidden_out b
    ]
    out_specs = (
        pl.BlockSpec((n_steps, Bb, S), lambda b, t: (0, b, 0)),   # alpha, resident over t
        pl.BlockSpec((Bb, H), lambda b, t: (b, 0)),               # final h
        pl.BlockSpec((Bb, H), lambda b, t: (b, 0)),               # final c
    )
    out_shape = (
        jax.ShapeDtypeStruct((n_steps, B, S), f32),
        jax.ShapeDtypeStruct((B, H), f32),
        jax.ShapeDtypeStruct((B, H), f32),
    )
    scratch_shapes = [
        pltpu.VMEM((Bb, H), f32),     # h carry
        pltpu.VMEM((Bb, H), f32),     # c carry
        pltpu.VMEM((Bb, S), f32),     # mask carry
        pltpu.VMEM((Bb, Din), f32),   # x carry
    ]
    return pl.pallas_call(
        _decoder_kernel,
        out_shape=out_shape,
        grid_spec=pltpu.PrefetchScalarGridSpec(
            num_scalar_prefetch=0,
            grid=(nb, n_steps),           # (parallel batch blocks, sequential steps)
            in_specs=in_specs,
            out_specs=out_specs,
            scratch_shapes=scratch_shapes,
        ),
        compiler_params=pltpu.CompilerParams(
            dimension_semantics=("parallel", "arbitrary"),
            vmem_limit_bytes=32 * 1024 * 1024,
        ),
    )


def decoder_forward(params, embedded_inputs, decoder_input_init, hidden, context,
                    n_steps=2, batch_block=None):
    B, S, Din = embedded_inputs.shape
    h0, c0 = hidden
    H = h0.shape[1]
    f32, bf16 = jnp.float32, jnp.bfloat16

    # Step-invariant context projection (Conv1d k=1 == per-position Linear),
    # hoisted out of the decode loop; stays resident in VMEM inside the kernel.
    ctx = jnp.matmul(context, params["w_ctx"]) + params["b_ctx"]        # (B, S, H)

    # Fused LSTM gate bias; gate order (input, forget, cell, out) as chunk(4,1).
    b_gate = (params["b_ih"] + params["b_hh"]).reshape(1, 4 * H)

    # hidden_out split for the cat((hidden_state, h_t)) matmul.
    w_out_hs = params["w_out"][:H, :]
    w_out_ht = params["w_out"][H:, :]

    step_call = _build_decoder_call(n_steps, B, S, Din, H, batch_block=batch_block)
    alpha_seq, h_last, c_last = step_call(
        decoder_input_init.astype(f32), h0.astype(f32), c0.astype(f32),
        ctx.astype(bf16), embedded_inputs.astype(bf16),
        params["w_ih"].astype(bf16), params["w_hh"].astype(bf16), b_gate.astype(f32),
        params["w_inp"].astype(bf16), params["b_inp"].astype(f32),
        params["v"].astype(f32),
        w_out_hs.astype(bf16), w_out_ht.astype(bf16), params["b_out"].astype(f32))

    outputs = jnp.transpose(alpha_seq, (1, 0, 2))                       # (B, n_steps, S)
    # Pointer = first argmax of (alpha * mask); already-picked positions have
    # alpha == 0 exactly (exp(-inf) in f32), so argmax(alpha) is identical.
    pointers = jnp.argmax(outputs, axis=-1).astype(jnp.int32)           # (B, n_steps)
    return (outputs, pointers), (h_last, c_last)


def init_params(key, input_dim, hidden_dim):
    """Deterministic init mimicking PyTorch defaults (uniform +/- 1/sqrt(fan_in))."""
    H = hidden_dim
    ks = jax.random.split(key, 11)

    def uni(k, shape, fan_in):
        b = 1.0 / math.sqrt(fan_in)
        return jax.random.uniform(k, shape, jnp.float32, -b, b)

    return dict(
        w_ih=uni(ks[0], (input_dim, 4 * H), input_dim),   # (in, out) layout
        b_ih=uni(ks[1], (1, 4 * H), input_dim),
        w_hh=uni(ks[2], (H, 4 * H), H),
        b_hh=uni(ks[3], (1, 4 * H), H),
        w_inp=uni(ks[4], (H, H), H),                      # Attention.input_linear
        b_inp=uni(ks[5], (1, H), H),
        w_ctx=uni(ks[6], (H, H), H),                      # Attention.context_linear (1x1 conv)
        b_ctx=uni(ks[7], (1, H), H),
        v=jax.random.uniform(ks[8], (1, H), jnp.float32, -1.0, 1.0),  # Attention.V
        w_out=uni(ks[9], (2 * H, H), 2 * H),              # hidden_out
        b_out=uni(ks[10], (1, H), 2 * H),
    )


if __name__ == "__main__":
    key = jax.random.PRNGKey(0)
    B, S, Din, H = 2, 8, 16, 32
    k1, k2, k3, k4, k5, kp = jax.random.split(key, 6)

    embedded_inputs = jax.random.normal(k1, (B, S, Din), jnp.float32)
    decoder_input_init = jax.random.normal(k2, (B, Din), jnp.float32)
    h0 = jax.random.normal(k3, (B, H), jnp.float32)
    c0 = jax.random.normal(k4, (B, H), jnp.float32)
    context = jax.random.normal(k5, (B, S, H), jnp.float32)
    params = init_params(kp, Din, H)

    (outputs, pointers), (h_last, c_last) = decoder_forward(
        params, embedded_inputs, decoder_input_init, (h0, c0), context)
    jax.block_until_ready((outputs, pointers, h_last, c_last))

    assert outputs.shape == (B, 2, S)
    assert pointers.shape == (B, 2)
    assert h_last.shape == (B, H) and c_last.shape == (B, H)
    assert bool(jnp.all(jnp.isfinite(outputs)))
    # Each decode step must pick a distinct position (mask carry works).
    assert bool(jnp.all(pointers[:, 0] != pointers[:, 1]))
    print("KERNEL_OK")
</pallas_src>

<mosaic_0001>
module attributes {stable_mosaic.version = 11 : i64} {
  func.func @_decoder_kernel(%arg0: i32, %arg1: i32, %arg2: memref<2x16xf32, #tpu.memory_space<vmem>>, %arg3: memref<2x32xf32, #tpu.memory_space<vmem>>, %arg4: memref<2x32xf32, #tpu.memory_space<vmem>>, %arg5: memref<2x8x32xbf16, #tpu.memory_space<vmem>>, %arg6: memref<2x8x16xbf16, #tpu.memory_space<vmem>>, %arg7: memref<16x128xbf16, #tpu.memory_space<vmem>>, %arg8: memref<32x128xbf16, #tpu.memory_space<vmem>>, %arg9: memref<1x128xf32, #tpu.memory_space<vmem>>, %arg10: memref<32x32xbf16, #tpu.memory_space<vmem>>, %arg11: memref<1x32xf32, #tpu.memory_space<vmem>>, %arg12: memref<1x32xf32, #tpu.memory_space<vmem>>, %arg13: memref<32x32xbf16, #tpu.memory_space<vmem>>, %arg14: memref<32x32xbf16, #tpu.memory_space<vmem>>, %arg15: memref<1x32xf32, #tpu.memory_space<vmem>>, %arg16: memref<2x2x8xf32, #tpu.memory_space<vmem>>, %arg17: memref<2x32xf32, #tpu.memory_space<vmem>>, %arg18: memref<2x32xf32, #tpu.memory_space<vmem>>, %arg19: memref<2x32xf32, #tpu.memory_space<vmem>>, %arg20: memref<2x32xf32, #tpu.memory_space<vmem>>, %arg21: memref<2x8xf32, #tpu.memory_space<vmem>>, %arg22: memref<2x16xf32, #tpu.memory_space<vmem>>) attributes {dimension_semantics = [#tpu.dimension_semantics<parallel>, #tpu.dimension_semantics<arbitrary>], iteration_bounds = array<i64: 1, 2>, scalar_prefetch = 0 : i64, scratch_operands = 4 : i64, tpu.core_type = #tpu.core_type<tc>, window_params = [{transform_indices = @transform_0, window_bounds = array<i64: 2, 16>}, {transform_indices = @transform_1, window_bounds = array<i64: 2, 32>}, {transform_indices = @transform_2, window_bounds = array<i64: 2, 32>}, {transform_indices = @transform_3, window_bounds = array<i64: 2, 8, 32>}, {transform_indices = @transform_4, window_bounds = array<i64: 2, 8, 16>}, {pipeline_mode = #tpu.pipeline_mode<synchronous>, transform_indices = @transform_5, window_bounds = array<i64: 16, 128>}, {pipeline_mode = #tpu.pipeline_mode<synchronous>, transform_indices = @transform_6, window_bounds = array<i64: 32, 128>}, {pipeline_mode = #tpu.pipeline_mode<synchronous>, transform_indices = @transform_7, window_bounds = array<i64: 1, 128>}, {pipeline_mode = #tpu.pipeline_mode<synchronous>, transform_indices = @transform_8, window_bounds = array<i64: 32, 32>}, {pipeline_mode = #tpu.pipeline_mode<synchronous>, transform_indices = @transform_9, window_bounds = array<i64: 1, 32>}, {pipeline_mode = #tpu.pipeline_mode<synchronous>, transform_indices = @transform_10, window_bounds = array<i64: 1, 32>}, {pipeline_mode = #tpu.pipeline_mode<synchronous>, transform_indices = @transform_11, window_bounds = array<i64: 32, 32>}, {pipeline_mode = #tpu.pipeline_mode<synchronous>, transform_indices = @transform_12, window_bounds = array<i64: 32, 32>}, {pipeline_mode = #tpu.pipeline_mode<synchronous>, transform_indices = @transform_13, window_bounds = array<i64: 1, 32>}, {transform_indices = @transform_14, window_bounds = array<i64: 2, 2, 8>}, {transform_indices = @transform_15, window_bounds = array<i64: 2, 32>}, {transform_indices = @transform_16, window_bounds = array<i64: 2, 32>}]} {
    %c0_i32 = arith.constant 0 : i32
    %0 = arith.cmpi eq, %arg1, %c0_i32 : i32
    %1 = arith.extui %0 : i1 to i32
    %c0_i32_0 = arith.constant 0 : i32
    %2 = arith.cmpi ne, %1, %c0_i32_0 : i32
    scf.if %2 {
      %c0_60 = arith.constant 0 : index
      %c0_61 = arith.constant 0 : index
      %121 = vector.load %arg3[%c0_60, %c0_61] : memref<2x32xf32, #tpu.memory_space<vmem>>, vector<2x32xf32>
      %c0_62 = arith.constant 0 : index
      %c0_63 = arith.constant 0 : index
      %122 = vector.load %arg19[%c0_62, %c0_63] : memref<2x32xf32, #tpu.memory_space<vmem>>, vector<2x32xf32>
      tpu.vector_store %arg19[%c0_62, %c0_63], %121 {strides = array<i32>} : memref<2x32xf32, #tpu.memory_space<vmem>>, vector<2x32xf32>,
      %c0_64 = arith.constant 0 : index
      %c0_65 = arith.constant 0 : index
      %123 = vector.load %arg4[%c0_64, %c0_65] : memref<2x32xf32, #tpu.memory_space<vmem>>, vector<2x32xf32>
      %c0_66 = arith.constant 0 : index
      %c0_67 = arith.constant 0 : index
      %124 = vector.load %arg20[%c0_66, %c0_67] : memref<2x32xf32, #tpu.memory_space<vmem>>, vector<2x32xf32>
      tpu.vector_store %arg20[%c0_66, %c0_67], %123 {strides = array<i32>} : memref<2x32xf32, #tpu.memory_space<vmem>>, vector<2x32xf32>,
      %c0_68 = arith.constant 0 : index
      %c0_69 = arith.constant 0 : index
      %125 = vector.load %arg2[%c0_68, %c0_69] : memref<2x16xf32, #tpu.memory_space<vmem>>, vector<2x16xf32>
      %c0_70 = arith.constant 0 : index
      %c0_71 = arith.constant 0 : index
      %126 = vector.load %arg22[%c0_70, %c0_71] : memref<2x16xf32, #tpu.memory_space<vmem>>, vector<2x16xf32>
      tpu.vector_store %arg22[%c0_70, %c0_71], %125 {strides = array<i32>} : memref<2x16xf32, #tpu.memory_space<vmem>>, vector<2x16xf32>,
      %cst_72 = arith.constant 1.000000e+00 : f32
      %127 = vector.broadcast %cst_72 : f32 to vector<2x8xf32>
      %c0_73 = arith.constant 0 : index
      %c0_74 = arith.constant 0 : index
      %128 = vector.load %arg21[%c0_73, %c0_74] : memref<2x8xf32, #tpu.memory_space<vmem>>, vector<2x8xf32>
      tpu.vector_store %arg21[%c0_73, %c0_74], %127 {strides = array<i32>} : memref<2x8xf32, #tpu.memory_space<vmem>>, vector<2x8xf32>,
    } else {
    }
    %c0 = arith.constant 0 : index
    %c0_1 = arith.constant 0 : index
    %3 = vector.load %arg22[%c0, %c0_1] : memref<2x16xf32, #tpu.memory_space<vmem>>, vector<2x16xf32>
    %c0_2 = arith.constant 0 : index
    %c0_3 = arith.constant 0 : index
    %4 = vector.load %arg19[%c0_2, %c0_3] : memref<2x32xf32, #tpu.memory_space<vmem>>, vector<2x32xf32>
    %c0_4 = arith.constant 0 : index
    %c0_5 = arith.constant 0 : index
    %5 = vector.load %arg20[%c0_4, %c0_5] : memref<2x32xf32, #tpu.memory_space<vmem>>, vector<2x32xf32>
    %c0_6 = arith.constant 0 : index
    %c0_7 = arith.constant 0 : index
    %6 = vector.load %arg21[%c0_6, %c0_7] : memref<2x8xf32, #tpu.memory_space<vmem>>, vector<2x8xf32>
    %c0_8 = arith.constant 0 : index
    %c0_9 = arith.constant 0 : index
    %c0_10 = arith.constant 0 : index
    %7 = vector.load %arg5[%c0_8, %c0_9, %c0_10] : memref<2x8x32xbf16, #tpu.memory_space<vmem>>, vector<2x8x32xbf16>
    %8 = arith.extf %7 : vector<2x8x32xbf16> to vector<2x8x32xf32>
    %9 = arith.truncf %3 : vector<2x16xf32> to vector<2x16xbf16>
    %c0_11 = arith.constant 0 : index
    %c0_12 = arith.constant 0 : index
    %10 = vector.load %arg7[%c0_11, %c0_12] : memref<16x128xbf16, #tpu.memory_space<vmem>>, vector<16x128xbf16>
    %cst = arith.constant dense<0.000000e+00> : vector<2x128xf32>
    %11 = tpu.matmul %9, %10, %cst {dimension_numbers = #tpu.dot_dimension_numbers<[1], [0], [0], [1], [0, 0, 1, 1], [], []>} : vector<2x16xbf16>, vector<16x128xbf16>, vector<2x128xf32> -> vector<2x128xf32>
    %12 = arith.truncf %4 : vector<2x32xf32> to vector<2x32xbf16>
    %c0_13 = arith.constant 0 : index
    %c0_14 = arith.constant 0 : index
    %13 = vector.load %arg8[%c0_13, %c0_14] : memref<32x128xbf16, #tpu.memory_space<vmem>>, vector<32x128xbf16>
    %cst_15 = arith.constant dense<0.000000e+00> : vector<2x128xf32>
    %14 = tpu.matmul %12, %13, %cst_15 {dimension_numbers = #tpu.dot_dimension_numbers<[1], [0], [0], [1], [0, 0, 1, 1], [], []>} : vector<2x32xbf16>, vector<32x128xbf16>, vector<2x128xf32> -> vector<2x128xf32>
    %15 = arith.addf %11, %14 : vector<2x128xf32>
    %c0_16 = arith.constant 0 : index
    %c0_17 = arith.constant 0 : index
    %16 = vector.load %arg9[%c0_16, %c0_17] : memref<1x128xf32, #tpu.memory_space<vmem>>, vector<1x128xf32>
    %17 = vector.broadcast %16 : vector<1x128xf32> to vector<2x128xf32>
    %18 = arith.addf %15, %17 : vector<2x128xf32>
    %19 = vector.extract_strided_slice %18 {offsets = [0, 0], sizes = [2, 32], strides = [1, 1]} : vector<2x128xf32> to vector<2x32xf32>
    %20 = arith.negf %19 : vector<2x32xf32>
    %21 = math.exp %20 : vector<2x32xf32>
    %cst_18 = arith.constant 1.000000e+00 : f32
    %22 = vector.broadcast %cst_18 : f32 to vector<2x32xf32>
    %23 = arith.addf %22, %21 : vector<2x32xf32>
    %24 = arith.divf %22, %23 : vector<2x32xf32>
    %25 = vector.extract_strided_slice %18 {offsets = [0, 32], sizes = [2, 32], strides = [1, 1]} : vector<2x128xf32> to vector<2x32xf32>
    %26 = arith.negf %25 : vector<2x32xf32>
    %27 = math.exp %26 : vector<2x32xf32>
    %cst_19 = arith.constant 1.000000e+00 : f32
    %28 = vector.broadcast %cst_19 : f32 to vector<2x32xf32>
    %29 = arith.addf %28, %27 : vector<2x32xf32>
    %30 = arith.divf %28, %29 : vector<2x32xf32>
    %31 = vector.extract_strided_slice %18 {offsets = [0, 64], sizes = [2, 32], strides = [1, 1]} : vector<2x128xf32> to vector<2x32xf32>
    %32 = math.tanh %31 : vector<2x32xf32>
    %33 = vector.extract_strided_slice %18 {offsets = [0, 96], sizes = [2, 32], strides = [1, 1]} : vector<2x128xf32> to vector<2x32xf32>
    %34 = arith.negf %33 : vector<2x32xf32>
    %35 = math.exp %34 : vector<2x32xf32>
    %cst_20 = arith.constant 1.000000e+00 : f32
    %36 = vector.broadcast %cst_20 : f32 to vector<2x32xf32>
    %37 = arith.addf %36, %35 : vector<2x32xf32>
    %38 = arith.divf %36, %37 : vector<2x32xf32>
    %39 = arith.mulf %30, %5 : vector<2x32xf32>
    %40 = arith.mulf %24, %32 : vector<2x32xf32>
    %41 = arith.addf %39, %40 : vector<2x32xf32>
    %42 = math.tanh %41 : vector<2x32xf32>
    %43 = arith.mulf %38, %42 : vector<2x32xf32>
    %44 = arith.truncf %43 : vector<2x32xf32> to vector<2x32xbf16>
    %c0_21 = arith.constant 0 : index
    %c0_22 = arith.constant 0 : index
    %45 = vector.load %arg10[%c0_21, %c0_22] : memref<32x32xbf16, #tpu.memory_space<vmem>>, vector<32x32xbf16>
    %cst_23 = arith.constant dense<0.000000e+00> : vector<2x32xf32>
    %46 = tpu.matmul %44, %45, %cst_23 {dimension_numbers = #tpu.dot_dimension_numbers<[1], [0], [0], [1], [0, 0, 1, 1], [], []>} : vector<2x32xbf16>, vector<32x32xbf16>, vector<2x32xf32> -> vector<2x32xf32>
    %c0_24 = arith.constant 0 : index
    %c0_25 = arith.constant 0 : index
    %47 = vector.load %arg11[%c0_24, %c0_25] : memref<1x32xf32, #tpu.memory_space<vmem>>, vector<1x32xf32>
    %48 = vector.broadcast %47 : vector<1x32xf32> to vector<2x32xf32>
    %49 = arith.addf %46, %48 : vector<2x32xf32>
    %50 = vector.shape_cast %49 : vector<2x32xf32> to vector<2x1x32xf32>
    %51 = vector.broadcast %50 : vector<2x1x32xf32> to vector<2x8x32xf32>
    %52 = arith.addf %51, %8 : vector<2x8x32xf32>
    %53 = math.tanh %52 : vector<2x8x32xf32>
    %c0_26 = arith.constant 0 : index
    %c0_27 = arith.constant 0 : index
    %54 = vector.load %arg12[%c0_26, %c0_27] : memref<1x32xf32, #tpu.memory_space<vmem>>, vector<1x32xf32>
    %55 = vector.shape_cast %54 : vector<1x32xf32> to vector<1x1x32xf32>
    %56 = vector.broadcast %55 : vector<1x1x32xf32> to vector<2x8x32xf32>
    %57 = arith.mulf %53, %56 : vector<2x8x32xf32>
    %cst_28 = arith.constant dense<0.000000e+00> : vector<2x8xf32>
    %58 = vector.multi_reduction <add>, %57, %cst_28 [2] : vector<2x8x32xf32> to vector<2x8xf32>
    %cst_29 = arith.constant 0.000000e+00 : f32
    %59 = vector.broadcast %cst_29 : f32 to vector<2x8xf32>
    %60 = arith.cmpf ogt, %6, %59 : vector<2x8xf32>
    %cst_30 = arith.constant 0xFF800000 : f32
    %61 = vector.broadcast %cst_30 : f32 to vector<2x8xf32>
    %62 = arith.select %60, %58, %61 : vector<2x8xi1>, vector<2x8xf32>
    %cst_31 = arith.constant dense<0xFF800000> : vector<2xf32>
    %63 = vector.multi_reduction <maximumf>, %62, %cst_31 [1] : vector<2x8xf32> to vector<2xf32>
    %64 = vector.shape_cast %63 : vector<2xf32> to vector<2x1xf32>
    %65 = vector.broadcast %64 : vector<2x1xf32> to vector<2x8xf32>
    %66 = arith.subf %62, %65 : vector<2x8xf32>
    %67 = math.exp %66 : vector<2x8xf32>
    %cst_32 = arith.constant dense<0.000000e+00> : vector<2xf32>
    %68 = vector.multi_reduction <add>, %67, %cst_32 [1] : vector<2x8xf32> to vector<2xf32>
    %69 = vector.shape_cast %68 : vector<2xf32> to vector<2x1xf32>
    %70 = tpu.reciprocal %69 {approx = true} : vector<2x1xf32> -> vector<2x1xf32>
    %71 = vector.broadcast %70 : vector<2x1xf32> to vector<2x8xf32>
    %72 = arith.mulf %67, %71 : vector<2x8xf32>
    %73 = vector.shape_cast %72 : vector<2x8xf32> to vector<2x8x1xf32>
    %74 = vector.broadcast %73 : vector<2x8x1xf32> to vector<2x8x32xf32>
    %75 = arith.mulf %74, %8 : vector<2x8x32xf32>
    %cst_33 = arith.constant dense<0.000000e+00> : vector<2x32xf32>
    %76 = vector.multi_reduction <add>, %75, %cst_33 [1] : vector<2x8x32xf32> to vector<2x32xf32>
    %77 = arith.truncf %76 : vector<2x32xf32> to vector<2x32xbf16>
    %c0_34 = arith.constant 0 : index
    %c0_35 = arith.constant 0 : index
    %78 = vector.load %arg13[%c0_34, %c0_35] : memref<32x32xbf16, #tpu.memory_space<vmem>>, vector<32x32xbf16>
    %cst_36 = arith.constant dense<0.000000e+00> : vector<2x32xf32>
    %79 = tpu.matmul %77, %78, %cst_36 {dimension_numbers = #tpu.dot_dimension_numbers<[1], [0], [0], [1], [0, 0, 1, 1], [], []>} : vector<2x32xbf16>, vector<32x32xbf16>, vector<2x32xf32> -> vector<2x32xf32>
    %80 = arith.truncf %43 : vector<2x32xf32> to vector<2x32xbf16>
    %c0_37 = arith.constant 0 : index
    %c0_38 = arith.constant 0 : index
    %81 = vector.load %arg14[%c0_37, %c0_38] : memref<32x32xbf16, #tpu.memory_space<vmem>>, vector<32x32xbf16>
    %cst_39 = arith.constant dense<0.000000e+00> : vector<2x32xf32>
    %82 = tpu.matmul %80, %81, %cst_39 {dimension_numbers = #tpu.dot_dimension_numbers<[1], [0], [0], [1], [0, 0, 1, 1], [], []>} : vector<2x32xbf16>, vector<32x32xbf16>, vector<2x32xf32> -> vector<2x32xf32>
    %83 = arith.addf %79, %82 : vector<2x32xf32>
    %c0_40 = arith.constant 0 : index
    %c0_41 = arith.constant 0 : index
    %84 = vector.load %arg15[%c0_40, %c0_41] : memref<1x32xf32, #tpu.memory_space<vmem>>, vector<1x32xf32>
    %85 = vector.broadcast %84 : vector<1x32xf32> to vector<2x32xf32>
    %86 = arith.addf %83, %85 : vector<2x32xf32>
    %87 = math.tanh %86 : vector<2x32xf32>
    %cst_42 = arith.constant dense<0xFF800000> : vector<2xf32>
    %88 = vector.multi_reduction <maximumf>, %72, %cst_42 [1] : vector<2x8xf32> to vector<2xf32>
    %89 = vector.shape_cast %88 : vector<2xf32> to vector<2x1xf32>
    %90 = tpu.iota {dimensions = array<i32: 1>} : vector<2x8xi32>
    %91 = vector.broadcast %89 : vector<2x1xf32> to vector<2x8xf32>
    %92 = arith.cmpf oeq, %72, %91 : vector<2x8xf32>
    %c8_i32 = arith.constant 8 : i32
    %93 = vector.broadcast %c8_i32 : i32 to vector<2x8xi32>
    %94 = arith.select %92, %90, %93 : vector<2x8xi1>, vector<2x8xi32>
    %cst_43 = arith.constant dense<2147483647> : vector<2xi32>
    %95 = vector.multi_reduction <minsi>, %94, %cst_43 [1] : vector<2x8xi32> to vector<2xi32>
    %96 = vector.shape_cast %95 : vector<2xi32> to vector<2x1xi32>
    %97 = vector.broadcast %96 : vector<2x1xi32> to vector<2x8xi32>
    %98 = arith.cmpi eq, %90, %97 : vector<2x8xi32>
    %99 = arith.extui %98 : vector<2x8xi1> to vector<2x8xi32>
    %100 = arith.sitofp %99 : vector<2x8xi32> to vector<2x8xf32>
    %101 = vector.shape_cast %100 : vector<2x8xf32> to vector<2x8x1xf32>
    %c0_44 = arith.constant 0 : index
    %c0_45 = arith.constant 0 : index
    %c0_46 = arith.constant 0 : index
    %102 = vector.load %arg6[%c0_44, %c0_45, %c0_46] : memref<2x8x16xbf16, #tpu.memory_space<vmem>>, vector<2x8x16xbf16>
    %103 = arith.extf %102 : vector<2x8x16xbf16> to vector<2x8x16xf32>
    %104 = vector.broadcast %101 : vector<2x8x1xf32> to vector<2x8x16xf32>
    %105 = arith.mulf %104, %103 : vector<2x8x16xf32>
    %cst_47 = arith.constant dense<0.000000e+00> : vector<2x16xf32>
    %106 = vector.multi_reduction <add>, %105, %cst_47 [1] : vector<2x8x16xf32> to vector<2x16xf32>
    %107 = arith.index_cast %arg1 : i32 to index
    %c0_48 = arith.constant 0 : index
    %c0_49 = arith.constant 0 : index
    %108 = vector.load %arg16[%107, %c0_48, %c0_49] : memref<2x2x8xf32, #tpu.memory_space<vmem>>, vector<1x2x8xf32>
    %109 = vector.shape_cast %108 : vector<1x2x8xf32> to vector<2x8xf32>
    %110 = vector.shape_cast %72 : vector<2x8xf32> to vector<1x2x8xf32>
    tpu.vector_store %arg16[%107, %c0_48, %c0_49], %110 {strides = array<i32>} : memref<2x2x8xf32, #tpu.memory_space<vmem>>, vector<1x2x8xf32>,
    %c0_50 = arith.constant 0 : index
    %c0_51 = arith.constant 0 : index
    %111 = vector.load %arg19[%c0_50, %c0_51] : memref<2x32xf32, #tpu.memory_space<vmem>>, vector<2x32xf32>
    tpu.vector_store %arg19[%c0_50, %c0_51], %87 {strides = array<i32>} : memref<2x32xf32, #tpu.memory_space<vmem>>, vector<2x32xf32>,
    %c0_52 = arith.constant 0 : index
    %c0_53 = arith.constant 0 : index
    %112 = vector.load %arg20[%c0_52, %c0_53] : memref<2x32xf32, #tpu.memory_space<vmem>>, vector<2x32xf32>
    tpu.vector_store %arg20[%c0_52, %c0_53], %41 {strides = array<i32>} : memref<2x32xf32, #tpu.memory_space<vmem>>, vector<2x32xf32>,
    %cst_54 = arith.constant 1.000000e+00 : f32
    %113 = vector.broadcast %cst_54 : f32 to vector<2x8xf32>
    %114 = arith.subf %113, %100 : vector<2x8xf32>
    %115 = arith.mulf %6, %114 : vector<2x8xf32>
    %c0_55 = arith.constant 0 : index
    %c0_56 = arith.constant 0 : index
    %116 = vector.load %arg21[%c0_55, %c0_56] : memref<2x8xf32, #tpu.memory_space<vmem>>, vector<2x8xf32>
    tpu.vector_store %arg21[%c0_55, %c0_56], %115 {strides = array<i32>} : memref<2x8xf32, #tpu.memory_space<vmem>>, vector<2x8xf32>,
    %c0_57 = arith.constant 0 : index
    %c0_58 = arith.constant 0 : index
    %117 = vector.load %arg22[%c0_57, %c0_58] : memref<2x16xf32, #tpu.memory_space<vmem>>, vector<2x16xf32>
    tpu.vector_store %arg22[%c0_57, %c0_58], %106 {strides = array<i32>} : memref<2x16xf32, #tpu.memory_space<vmem>>, vector<2x16xf32>,
    %c1_i32 = arith.constant 1 : i32
    %118 = arith.cmpi eq, %arg1, %c1_i32 : i32
    %119 = arith.extui %118 : i1 to i32
    %c0_i32_59 = arith.constant 0 : i32
    %120 = arith.cmpi ne, %119, %c0_i32_59 : i32
    scf.if %120 {
      %c0_60 = arith.constant 0 : index
      %c0_61 = arith.constant 0 : index
      %121 = vector.load %arg17[%c0_60, %c0_61] : memref<2x32xf32, #tpu.memory_space<vmem>>, vector<2x32xf32>
      tpu.vector_store %arg17[%c0_60, %c0_61], %87 {strides = array<i32>} : memref<2x32xf32, #tpu.memory_space<vmem>>, vector<2x32xf32>,
      %c0_62 = arith.constant 0 : index
      %c0_63 = arith.constant 0 : index
      %122 = vector.load %arg18[%c0_62, %c0_63] : memref<2x32xf32, #tpu.memory_space<vmem>>, vector<2x32xf32>
      tpu.vector_store %arg18[%c0_62, %c0_63], %41 {strides = array<i32>} : memref<2x32xf32, #tpu.memory_space<vmem>>, vector<2x32xf32>,
    } else {
    }
    return
  }
  func.func @transform_0(%arg0: i32, %arg1: i32) -> (i32, i32) {
    %c0_i32 = arith.constant 0 : i32
    %c0_i32_0 = arith.constant 0 : i32
    return %arg0, %c0_i32 : i32, i32
  }
  func.func @transform_1(%arg0: i32, %arg1: i32) -> (i32, i32) {
    %c0_i32 = arith.constant 0 : i32
    %c0_i32_0 = arith.constant 0 : i32
    return %arg0, %c0_i32 : i32, i32
  }
  func.func @transform_2(%arg0: i32, %arg1: i32) -> (i32, i32) {
    %c0_i32 = arith.constant 0 : i32
    %c0_i32_0 = arith.constant 0 : i32
    return %arg0, %c0_i32 : i32, i32
  }
  func.func @transform_3(%arg0: i32, %arg1: i32) -> (i32, i32, i32) {
    %c0_i32 = arith.constant 0 : i32
    %c0_i32_0 = arith.constant 0 : i32
    %c0_i32_1 = arith.constant 0 : i32
    return %arg0, %c0_i32, %c0_i32_0 : i32, i32, i32
  }
  func.func @transform_4(%arg0: i32, %arg1: i32) -> (i32, i32, i32) {
    %c0_i32 = arith.constant 0 : i32
    %c0_i32_0 = arith.constant 0 : i32
    %c0_i32_1 = arith.constant 0 : i32
    return %arg0, %c0_i32, %c0_i32_0 : i32, i32, i32
  }
  func.func @transform_5(%arg0: i32, %arg1: i32) -> (i32, i32) {
    %c0_i32 = arith.constant 0 : i32
    %c0_i32_0 = arith.constant 0 : i32
    %c0_i32_1 = arith.constant 0 : i32
    return %c0_i32, %c0_i32_0 : i32, i32
  }
  func.func @transform_6(%arg0: i32, %arg1: i32) -> (i32, i32) {
    %c0_i32 = arith.constant 0 : i32
    %c0_i32_0 = arith.constant 0 : i32
    %c0_i32_1 = arith.constant 0 : i32
    return %c0_i32, %c0_i32_0 : i32, i32
  }
  func.func @transform_7(%arg0: i32, %arg1: i32) -> (i32, i32) {
    %c0_i32 = arith.constant 0 : i32
    %c0_i32_0 = arith.constant 0 : i32
    %c0_i32_1 = arith.constant 0 : i32
    return %c0_i32, %c0_i32_0 : i32, i32
  }
  func.func @transform_8(%arg0: i32, %arg1: i32) -> (i32, i32) {
    %c0_i32 = arith.constant 0 : i32
    %c0_i32_0 = arith.constant 0 : i32
    %c0_i32_1 = arith.constant 0 : i32
    return %c0_i32, %c0_i32_0 : i32, i32
  }
  func.func @transform_9(%arg0: i32, %arg1: i32) -> (i32, i32) {
    %c0_i32 = arith.constant 0 : i32
    %c0_i32_0 = arith.constant 0 : i32
    %c0_i32_1 = arith.constant 0 : i32
    return %c0_i32, %c0_i32_0 : i32, i32
  }
  func.func @transform_10(%arg0: i32, %arg1: i32) -> (i32, i32) {
    %c0_i32 = arith.constant 0 : i32
    %c0_i32_0 = arith.constant 0 : i32
    %c0_i32_1 = arith.constant 0 : i32
    return %c0_i32, %c0_i32_0 : i32, i32
  }
  func.func @transform_11(%arg0: i32, %arg1: i32) -> (i32, i32) {
    %c0_i32 = arith.constant 0 : i32
    %c0_i32_0 = arith.constant 0 : i32
    %c0_i32_1 = arith.constant 0 : i32
    return %c0_i32, %c0_i32_0 : i32, i32
  }
  func.func @transform_12(%arg0: i32, %arg1: i32) -> (i32, i32) {
    %c0_i32 = arith.constant 0 : i32
    %c0_i32_0 = arith.constant 0 : i32
    %c0_i32_1 = arith.constant 0 : i32
    return %c0_i32, %c0_i32_0 : i32, i32
  }
  func.func @transform_13(%arg0: i32, %arg1: i32) -> (i32, i32) {
    %c0_i32 = arith.constant 0 : i32
    %c0_i32_0 = arith.constant 0 : i32
    %c0_i32_1 = arith.constant 0 : i32
    return %c0_i32, %c0_i32_0 : i32, i32
  }
  func.func @transform_14(%arg0: i32, %arg1: i32) -> (i32, i32, i32) {
    %c0_i32 = arith.constant 0 : i32
    %c0_i32_0 = arith.constant 0 : i32
    %c0_i32_1 = arith.constant 0 : i32
    return %c0_i32, %arg0, %c0_i32_0 : i32, i32, i32
  }
  func.func @transform_15(%arg0: i32, %arg1: i32) -> (i32, i32) {
    %c0_i32 = arith.constant 0 : i32
    %c0_i32_0 = arith.constant 0 : i32
    return %arg0, %c0_i32 : i32, i32
  }
  func.func @transform_16(%arg0: i32, %arg1: i32) -> (i32, i32) {
    %c0_i32 = arith.constant 0 : i32
    %c0_i32_0 = arith.constant 0 : i32
    return %arg0, %c0_i32 : i32, i32
  }
}

</mosaic_0001>

<bundles_post_ra>
// kernel: tpu_custom_call.1
= control target key start
LH: loop header
LB: loop body
LE: loop exit
PB: predicated region body
PF: predicated region fallthrough
CT: control target
= control target key end

     0   :  { %s2720_s0 = inlined_call_operand.hbm [shape: f32[2,16], index: 0, kind: input, shape index: {}]   ;;  %s2721_s1 = inlined_call_operand.vmem [shape: f32[2,32], index: 1, kind: input, shape index: {}]   ;;  %s2722_s2 = inlined_call_operand.hbm [shape: f32[2,32], index: 2, kind: input, shape index: {}]   ;;  %s2723_s3 = inlined_call_operand.hbm [shape: bf16[2,8,32], index: 3, kind: input, shape index: {}]   ;;  %s2724_s4 = inlined_call_operand.hbm [shape: bf16[2,8,16], index: 4, kind: input, shape index: {}]   ;;  %s2725_s5 = inlined_call_operand.hbm [shape: bf16[16,128], index: 5, kind: input, shape index: {}]   ;;  %s2726_s6 = inlined_call_operand.vmem [shape: bf16[32,128], index: 6, kind: input, shape index: {}]   ;;  %s2727_s7 = inlined_call_operand.hbm [shape: f32[1,128], index: 7, kind: input, shape index: {}]   ;;  %s2728_s8 = inlined_call_operand.hbm [shape: bf16[32,32], index: 8, kind: input, shape index: {}]   ;;  %s2729_s9 = inlined_call_operand.hbm [shape: f32[1,32], index: 9, kind: input, shape index: {}]   ;;  %s2730_s10 = inlined_call_operand.vmem [shape: f32[1,32], index: 10, kind: input, shape index: {}]   ;;  %s2731_s11 = inlined_call_operand.vmem [shape: bf16[32,32], index: 11, kind: input, shape index: {}]   ;;  %s2732_s12 = inlined_call_operand.hbm [shape: bf16[32,32], index: 12, kind: input, shape index: {}]   ;;  %s2733_s13 = inlined_call_operand.vmem [shape: f32[1,32], index: 13, kind: input, shape index: {}]   ;;  %s2734_s14 = inlined_call_operand.hbm [shape: f32[2,2,8], index: 14, kind: output, shape index: {0}]   ;;  %s2735_s15 = inlined_call_operand.hbm [shape: f32[2,32], index: 15, kind: output, shape index: {1}]   ;;  %s2736_s16 = inlined_call_operand.hbm [shape: f32[2,32], index: 16, kind: output, shape index: {2}]  }
   0x1   :  { %2750 = sst [smem:[#allocation33_spill]] %s2720_s0 }
   0x2   :  { %2751 = sst [smem:[#allocation34_spill]] %s2722_s2 }
   0x3   :  { %2752 = sst [smem:[#allocation35_spill]] %s2723_s3 }
   0x4   :  { %2753 = sst [smem:[#allocation36_spill]] %s2724_s4 }
   0x5   :  { %2754 = sst [smem:[#allocation37_spill]] %s2733_s13 }
   0x6   :  { %2755 = sst [smem:[#allocation38_spill]] %s2734_s14 }
   0x7   :  { %2756 = sst [smem:[#allocation39_spill]] %s2735_s15 }
   0x8   :  { %2757 = sst [smem:[#allocation40_spill]] %s2736_s16 }
   0x9   :  { %22 = vsyncpa [#allocation7], 0 }
   0xa   :  { %23 = vsyncpa [#allocation10], 0 }
   0xb   :  { %24 = vsyncpa [#allocation13], 0 }
   0xc   :  { %25 = vsyncpa [#allocation16], 0 }
   0xd   :  { %26 = vsyncpa [#allocation19], 0 }
   0xe   :  { %27 = vsyncpa [#allocation8], 0 }
   0xf   :  { %28 = vsyncpa [#allocation23], 0  ;;  %s2239_s21 = smov 0   ;;  %s2241_s22 = smov 0  }
  0x10   :  { %s2243_s23 = smov 0  }
  0x11 LB: > { %2758 = sst [smem:[#allocation32_spill]] %s2130_s23  ;;  %s2132_s24 = smov [#allocation9]   ;;  %s2130_s23 = sphi %s2243_s23, %s34_s23   ;;  %s2126_s22 = sphi %s2241_s22, %s2782_s22   ;;  %s2122_s21 = sphi %s2239_s21, %s2781_s21  }
  0x12   : > { %s483_s25 = sshll.u32 %s2132_s24, 4  ;;  %s2738_s26 = sadd.s32 4294967295, %s2130_s23   ;;  %s2263_s25 = int_to_ptr.vmem [resolvable:$true] %s483_s25 }
  0x13   : > { %p1465_p0 = scmp.ge.s32.totalorder %s2130_s23, 1  ;;  %p448_p1 = scmp.lt.s32.totalorder %s2130_s23, 3 }
  0x14   : > { %p2259_p2 = scmp.eq.s32.totalorder %s2738_s26, 0  ;;  %s2133_s29 = smov [#allocation12]  }
  0x15   : > { %p2265_p3 = pnand %p1465_p0, %p448_p1  ;;  %s512_s30 = sshll.u32 %s2133_s29, 4  ;;  %s2271_s30 = int_to_ptr.vmem [resolvable:$true] %s512_s30 }
  0x16   : > { %s2759_s27 = scalar_select %p2259_p2, 1, 0 }
  0x17   : > { %s2760_s28 = scalar_select %p2265_p3, 1, 0 }
  0x18   : > { %p1625_p4 = pneg %p2265_p3  ;;  %s2134_s17 = smov [#allocation15]  }
  0x19   : > { %s542_s18 = sshll.u32 %s2134_s17, 4  ;;  %s2135_s19 = smov [#allocation18]   ;;  %s2279_s18 = int_to_ptr.vmem [resolvable:$true] %s542_s18 }
  0x1a   : > { %p2275_p5 = pnand %p2259_p2, %p1625_p4  ;;  %s2281_s20 = sshll.u32 %s2135_s19, 4  ;;  %s567_s20 = int_to_ptr.vmem [resolvable:$true] %s2281_s20 }
  0x1b   : > { %s2762_s2 = sld [smem:[#allocation34_spill]] }
  0x1c   : > { %p2291_p7 = pneg %p2275_p5 }
  0x21   : > { %s1750_s16 = scalar_lea.hbm %s2762_s2, 32 }
  0x22   : > { %p1751_p6 = scmp.ne.s32.totalorder %s2762_s2, %s1750_s16  ;;  %p1757_p10 = scmp.lt.u32.totalorder %s1750_s16, %s2762_s2 }
  0x24   : > { %p1753_p8 = pnand %p2291_p7, %p1751_p6 }
  0x26   : > { %p1754_p9 = pneg %p1753_p8 }
  0x28   : > { %p1759_p11 = pnand %p1757_p10, %p1754_p9 }
  0x2a   : > { %1762 = shalt.err (!%p1759_p11)
}
  0x2b   : > { %s1763_s14 = scalar_lea.vmem %s2263_s25, 32  ;;  %p1771_p1 = scmp.lt.s32.totalorder %s2263_s25, %s2263_s25 }
  0x2c   : > { %p1764_p12 = scmp.ne.s32.totalorder %s2263_s25, %s1763_s14  ;;  %p1772_p4 = scmp.lt.s32.totalorder %s1763_s14, %s1763_s14 }
  0x2e   : > { %p1766_p13 = pnand %p1764_p12, %p2291_p7  ;;  %p1773_p6 = por %p1772_p4, %p1771_p1 }
  0x30   : > { %p1767_p0 = pneg %p1766_p13 }
  0x32   : > { %p1774_p8 = pnand %p1773_p6, %p1767_p0 }
  0x34   : > { %1777 = shalt.err (!%p1774_p8)
}
  0x35   : > { %1631 = dma.hbm_to_vmem [thread:$0]  (!%p2275_p5), %s2762_s2, 32, %s2263_s25, [#allocation10]  }
  0x36   : > { %s2764_s4 = sld [smem:[#allocation36_spill]] }
  0x3c   : > { %s1778_s17 = scalar_lea.hbm %s2764_s4, 128 }
  0x3d   : > { %p1779_p9 = scmp.ne.s32.totalorder %s2764_s4, %s1778_s17  ;;  %p1785_p12 = scmp.lt.u32.totalorder %s1778_s17, %s2764_s4 }
  0x3f   : > { %p1781_p10 = pnand %p1779_p9, %p2291_p7 }
  0x41   : > { %p1782_p11 = pneg %p1781_p10 }
  0x43   : > { %p1787_p13 = pnand %p1785_p12, %p1782_p11 }
  0x45   : > { %1790 = shalt.err (!%p1787_p13)
}
  0x46   : > { %s1791_s25 = scalar_lea.vmem %s2271_s30, 128  ;;  %p1799_p6 = scmp.lt.s32.totalorder %s2271_s30, %s2271_s30 }
  0x47   : > { %p1792_p0 = scmp.ne.s32.totalorder %s2271_s30, %s1791_s25  ;;  %p1800_p8 = scmp.lt.s32.totalorder %s1791_s25, %s1791_s25 }
  0x49   : > { %p1794_p1 = pnand %p1792_p0, %p2291_p7  ;;  %p1801_p9 = por %p1800_p8, %p1799_p6 }
  0x4b   : > { %p1795_p4 = pneg %p1794_p1 }
  0x4d   : > { %p1802_p10 = pnand %p1801_p9, %p1795_p4 }
  0x4f   : > { %1805 = shalt.err (!%p1802_p10)
}
  0x50   : > { %s2746_s23 = smov 64   ;;  %s2748_s13 = smov 4  }
  0x51   : > { %1637 = dma.hbm_to_vmem [thread:$0]  (!%p2275_p5), %s2764_s4, 128, %s2271_s30, [#allocation13], %s2746_s23, %s2746_s23, %s2748_s13  }
  0x52   : > { %s1806_s17 = scalar_lea.hbm %s2727_s7, 16 }
  0x53   : > { %p1807_p11 = scmp.ne.s32.totalorder %s2727_s7, %s1806_s17  ;;  %p1813_p0 = scmp.lt.u32.totalorder %s1806_s17, %s2727_s7 }
  0x55   : > { %p1809_p12 = pnand %p1807_p11, %p2291_p7 }
  0x57   : > { %p1810_p13 = pneg %p1809_p12 }
  0x59   : > { %p1815_p1 = pnand %p1813_p0, %p1810_p13 }
  0x5b   : > { %1818 = shalt.err (!%p1815_p1)
}
  0x5c   : > { %s1819_s30 = scalar_lea.vmem %s2279_s18, 16  ;;  %s1826_s16 = scalar_lea.vmem %s2279_s18, 32 }
  0x5d   : > { %p1820_p4 = scmp.ne.s32.totalorder %s2279_s18, %s1819_s30  ;;  %p1827_p9 = scmp.lt.s32.totalorder %s2279_s18, %s2279_s18 }
  0x5e   : > { %p1828_p10 = scmp.lt.s32.totalorder %s1826_s16, %s1819_s30 }
  0x5f   : > { %p1822_p6 = pnand %p1820_p4, %p2291_p7 }
  0x60   : > { %p1829_p11 = por %p1828_p10, %p1827_p9 }
  0x61   : > { %p1823_p8 = pneg %p1822_p6 }
  0x63   : > { %p1830_p12 = pnand %p1829_p11, %p1823_p8 }
  0x65   : > { %1833 = shalt.err (!%p1830_p12)
}
  0x66   : > { %1643 = dma.hbm_to_vmem [thread:$0]  (!%p2275_p5), %s2727_s7, 16, %s2279_s18, [#allocation16]  }
  0x67   : > { %s1834_s17 = scalar_lea.hbm %s2729_s9, 16 }
  0x68   : > { %p1835_p13 = scmp.ne.s32.totalorder %s2729_s9, %s1834_s17  ;;  %p1841_p4 = scmp.lt.u32.totalorder %s1834_s17, %s2729_s9 }
  0x6a   : > { %p1837_p0 = pnand %p1835_p13, %p2291_p7 }
  0x6c   : > { %p1838_p1 = pneg %p1837_p0 }
  0x6e   : > { %p1843_p6 = pnand %p1841_p4, %p1838_p1 }
  0x70   : > { %1846 = shalt.err (!%p1843_p6)
}
  0x71   : > { %s1847_s16 = scalar_lea.vmem %s567_s20, 16  ;;  %s1854_s18 = scalar_lea.vmem %s567_s20, 32 }
  0x72   : > { %p1848_p8 = scmp.ne.s32.totalorder %s567_s20, %s1847_s16  ;;  %p1855_p11 = scmp.lt.s32.totalorder %s567_s20, %s567_s20 }
  0x73   : > { %p1856_p12 = scmp.lt.s32.totalorder %s1854_s18, %s1847_s16 }
  0x74   : > { %p1850_p9 = pnand %p1848_p8, %p2291_p7 }
  0x75   : > { %p1857_p2 = por %p1856_p12, %p1855_p11 }
  0x76   : > { %p1851_p10 = pneg %p1850_p9 }
  0x78   : > { %p1858_p3 = pnand %p1857_p2, %p1851_p10 }
  0x7a   : > { %1861 = shalt.err (!%p1858_p3)
}
  0x7b   : > { %1649 = dma.hbm_to_vmem [thread:$0]  (!%p2275_p5), %s2729_s9, 16, %s567_s20, [#allocation19]  }
  0x7c   : > { %s43_s24 = sadd.s32 1, %s2126_s22  ;;  %s2138_s29 = smov [#allocation6]  }
  0x7d   : > { %s463_s17 = sshll.u32 %s2138_s29, 4  ;;  %p2382_p13 = scmp.ge.s32.totalorder %s43_s24, 2  ;;  %s464_s17 = int_to_ptr.vmem [resolvable:$true] %s463_s17 }
  0x7e   : > { %s2766_s30 = sld [smem:[#allocation33_spill]] }
  0x7f   : > { %s2765_s19 = scalar_select %p2382_p13, 1, 0 }
  0x84   : > { %s1862_s16 = scalar_lea.hbm %s2766_s30, 32 }
  0x85   : > { %p1863_p2 = scmp.ne.s32.totalorder %s2766_s30, %s1862_s16  ;;  %p1869_p1 = scmp.lt.u32.totalorder %s1862_s16, %s2766_s30 }
  0x87   : > { %p1865_p3 = pnand %p1863_p2, %p2291_p7 }
  0x89   : > { %p1866_p0 = pneg %p1865_p3 }
  0x8b   : > { %p1871_p4 = pnand %p1869_p1, %p1866_p0 }
  0x8d   : > { %1874 = shalt.err (!%p1871_p4)
}
  0x8e   : > { %s1875_s26 = scalar_lea.vmem %s464_s17, 32  ;;  %p1883_p10 = scmp.lt.s32.totalorder %s464_s17, %s464_s17 }
  0x8f   : > { %p1876_p6 = scmp.ne.s32.totalorder %s464_s17, %s1875_s26  ;;  %p1884_p11 = scmp.lt.s32.totalorder %s1875_s26, %s1875_s26 }
  0x91   : > { %p1878_p8 = pnand %p1876_p6, %p2291_p7  ;;  %p1885_p12 = por %p1884_p11, %p1883_p10 }
  0x93   : > { %p1879_p9 = pneg %p1878_p8 }
  0x95   : > { %p1886_p13 = pnand %p1885_p12, %p1879_p9 }
  0x97   : > { %1889 = shalt.err (!%p1886_p13)
}
  0x98   : > { %1628 = dma.hbm_to_vmem [thread:$0]  (!%p2275_p5), %s2766_s30, 32, %s464_s17, [#allocation7]  }
  0x99   : > { %p2767_p2 = scmp.ne.s32.totalorder %s2765_s19, 0  ;;  %s2139_s14 = smov [#allocation11]  }
  0x9a   : > { %s496_s25 = sshll.u32 %s2139_s14, 4  ;;  %s2140_s16 = smov [#allocation14]   ;;  %s497_s25 = int_to_ptr.vmem [resolvable:$true] %s496_s25 }
  0x9b   : > { %s2784_s24 = smov (%p2767_p2, %s43_s24), 0  ;;  %s525_s18 = sshll.u32 %s2140_s16, 4  ;;  %s2408_s18 = int_to_ptr.vmem [resolvable:$true] %s525_s18 }
  0x9c   : > { %s2768_s3 = sld [smem:[#allocation35_spill]] }
  0xa2   : > { %s1890_s26 = scalar_lea.hbm %s2768_s3, 128 }
  0xa3   : > { %p1891_p13 = scmp.ne.s32.totalorder %s2768_s3, %s1890_s26  ;;  %p1897_p1 = scmp.lt.u32.totalorder %s1890_s26, %s2768_s3 }
  0xa5   : > { %p1893_p3 = pnand %p1891_p13, %p2291_p7 }
  0xa7   : > { %p1894_p0 = pneg %p1893_p3 }
  0xa9   : > { %p1899_p4 = pnand %p1897_p1, %p1894_p0 }
  0xab   : > { %1902 = shalt.err (!%p1899_p4)
}
  0xac   : > { %s1903_s23 = scalar_lea.vmem %s497_s25, 128  ;;  %p1911_p10 = scmp.lt.s32.totalorder %s497_s25, %s497_s25 }
  0xad   : > { %p1904_p6 = scmp.ne.s32.totalorder %s497_s25, %s1903_s23  ;;  %p1912_p11 = scmp.lt.s32.totalorder %s1903_s23, %s1903_s23 }
  0xaf   : > { %p1906_p8 = pnand %p1904_p6, %p2291_p7  ;;  %p1913_p12 = por %p1912_p11, %p1911_p10 }
  0xb1   : > { %p1907_p9 = pneg %p1906_p8 }
  0xb3   : > { %p1914_p2 = pnand %p1913_p12, %p1907_p9 }
  0xb5   : > { %1917 = shalt.err (!%p1914_p2)
}
  0xb6   : > { %s2769_s4 = smov 4   ;;  %s2770_s13 = smov 64  }
  0xb7   : > { %1634 = dma.hbm_to_vmem [thread:$0]  (!%p2275_p5), %s2768_s3, 128, %s497_s25, [#allocation10], %s2770_s13, %s2770_s13, %s2769_s4  }
  0xb8   : > { %s1918_s2 = scalar_lea.hbm %s2725_s5, 128 }
  0xb9   : > { %p1919_p13 = scmp.ne.s32.totalorder %s2725_s5, %s1918_s2  ;;  %p1925_p1 = scmp.lt.u32.totalorder %s1918_s2, %s2725_s5 }
  0xbb   : > { %p1921_p3 = pnand %p1919_p13, %p2291_p7 }
  0xbd   : > { %p1922_p0 = pneg %p1921_p3 }
  0xbf   : > { %p1927_p4 = pnand %p1925_p1, %p1922_p0 }
  0xc1   : > { %1930 = shalt.err (!%p1927_p4)
}
  0xc2   : > { %s1931_s25 = scalar_lea.vmem %s2408_s18, 128  ;;  %p1939_p10 = scmp.lt.s32.totalorder %s2408_s18, %s2408_s18 }
  0xc3   : > { %p1932_p6 = scmp.ne.s32.totalorder %s2408_s18, %s1931_s25  ;;  %p1940_p11 = scmp.lt.s32.totalorder %s1931_s25, %s1931_s25 }
  0xc5   : > { %p1934_p8 = pnand %p1932_p6, %p2291_p7  ;;  %p1941_p12 = por %p1940_p11, %p1939_p10 }
  0xc7   : > { %p1935_p9 = pneg %p1934_p8 }
  0xc9   : > { %p1942_p2 = pnand %p1941_p12, %p1935_p9 }
  0xcb   : > { %1945 = shalt.err (!%p1942_p2)
}
  0xcc   : > { %1640 = dma.hbm_to_vmem [thread:$0]  (!%p2275_p5), %s2725_s5, 128, %s2408_s18, [#allocation13], %s2770_s13, %s2770_s13, %s2769_s4  }
  0xcd   : > { %s2141_s16 = smov [#allocation17]   ;;  %s2142_s2 = smov [#allocation20]  }
  0xce   : > { %s552_s20 = sshll.u32 %s2141_s16, 4  ;;  %s582_s26 = sshll.u32 %s2142_s2, 4  ;;  %s553_s20 = int_to_ptr.vmem [resolvable:$true] %s552_s20  ;;  %s2457_s26 = int_to_ptr.vmem [resolvable:$true] %s582_s26 }
  0xcf   : > { %s1946_s23 = scalar_lea.hbm %s2728_s8, 256 }
  0xd0   : > { %p1947_p13 = scmp.ne.s32.totalorder %s2728_s8, %s1946_s23  ;;  %p1953_p1 = scmp.lt.u32.totalorder %s1946_s23, %s2728_s8 }
  0xd2   : > { %p1949_p3 = pnand %p1947_p13, %p2291_p7 }
  0xd4   : > { %p1950_p0 = pneg %p1949_p3 }
  0xd6   : > { %p1955_p4 = pnand %p1953_p1, %p1950_p0 }
  0xd8   : > { %1958 = shalt.err (!%p1955_p4)
}
  0xd9   : > { %s1959_s14 = scalar_lea.vmem %s553_s20, 256  ;;  %p1967_p10 = scmp.lt.s32.totalorder %s553_s20, %s553_s20 }
  0xda   : > { %p1960_p6 = scmp.ne.s32.totalorder %s553_s20, %s1959_s14  ;;  %p1968_p11 = scmp.lt.s32.totalorder %s1959_s14, %s1959_s14 }
  0xdc   : > { %p1962_p8 = pnand %p1960_p6, %p2291_p7  ;;  %p1969_p12 = por %p1968_p11, %p1967_p10 }
  0xde   : > { %p1963_p9 = pneg %p1962_p8 }
  0xe0   : > { %p1970_p2 = pnand %p1969_p12, %p1963_p9 }
  0xe2   : > { %1973 = shalt.err (!%p1970_p2)
}
  0xe3   : > { %1646 = dma.hbm_to_vmem [thread:$0]  (!%p2275_p5), %s2728_s8, 256, %s553_s20, [#allocation16], %s2770_s13, %s2770_s13, %s2769_s4  }
  0xe4   : > { %s1974_s19 = scalar_lea.hbm %s2732_s12, 256 }
  0xe5   : > { %p1975_p13 = scmp.ne.s32.totalorder %s2732_s12, %s1974_s19  ;;  %p1981_p1 = scmp.lt.u32.totalorder %s1974_s19, %s2732_s12 }
  0xe7   : > { %p1977_p3 = pnand %p1975_p13, %p2291_p7 }
  0xe9   : > { %p1978_p0 = pneg %p1977_p3 }
  0xeb   : > { %p1983_p4 = pnand %p1981_p1, %p1978_p0 }
  0xed   : > { %1986 = shalt.err (!%p1983_p4)
}
  0xee   : > { %s1987_s20 = scalar_lea.vmem %s2457_s26, 256  ;;  %p1995_p10 = scmp.lt.s32.totalorder %s2457_s26, %s2457_s26 }
  0xef   : > { %p1988_p6 = scmp.ne.s32.totalorder %s2457_s26, %s1987_s20  ;;  %p1996_p11 = scmp.lt.s32.totalorder %s1987_s20, %s1987_s20 }
  0xf1   : > { %p1990_p8 = pnand %p1988_p6, %p2291_p7  ;;  %p1997_p12 = por %p1996_p11, %p1995_p10 }
  0xf3   : > { %p1991_p9 = pneg %p1990_p8 }
  0xf5   : > { %p1998_p2 = pnand %p1997_p12, %p1991_p9 }
  0xf7   : > { %2001 = shalt.err (!%p1998_p2)
}
  0xf8   : > { %1652 = dma.hbm_to_vmem [thread:$0]  (!%p2275_p5), %s2732_s12, 256, %s2457_s26, [#allocation19], %s2770_s13, %s2770_s13, %s2769_s4  }
  0xf9   : > { %p2771_p13 = scmp.ne.s32.totalorder %s2760_s28, 0 }
  0xfa   : > { %p2772_p7 = scmp.ne.s32.totalorder (!%p2771_p13), %s2759_s27, 0 }
  0xfb   : > { %601 = sbr.rel (%p2771_p13) target bundleno = 2397 (0x95d), region = 76 }
 0x102   : > { %2093 = dma.done.wait (%p2772_p7), [#allocation7], 32  }
 0x103   : > { %2095 = vsyncadd (%p2772_p7), [#allocation7], 4294967264 }
 0x104   : > { %2097 = dma.done.wait (%p2772_p7), [#allocation10], 160  }
 0x105   : > { %2099 = vsyncadd (%p2772_p7), [#allocation10], 4294967136 }
 0x106   : > { %2101 = dma.done.wait (%p2772_p7), [#allocation13], 256  }
 0x107   : > { %2103 = vsyncadd (%p2772_p7), [#allocation13], 4294967040 }
 0x108   : > { %2105 = dma.done.wait (%p2772_p7), [#allocation16], 272  }
 0x109   : > { %2107 = vsyncadd (%p2772_p7), [#allocation16], 4294967024 }
 0x10a   : > { %2109 = dma.done.wait (%p2772_p7), [#allocation19], 272  }
 0x10b   : > { %2111 = vsyncadd (%p2772_p7), [#allocation19], 4294967024  ;;  %p1486_p5 = scmp.ne.s32.totalorder %s2122_s21, 0 }
 0x10c   : > { %v688_v0 = vld [vmem:[%s2721_s1] sm:$0x3] (!%p1486_p5)  ;;  %vm689_vm0 = vcmask (!%p1486_p5), 254976   ;;  %v691_v1 = vld [vmem:[#allocation9] sm:$0x3] (!%p1486_p5)  ;;  %vm694_vm1 = vcmask (!%p1486_p5), 123904  }
 0x10d   : > { %687 = sbr.rel (%p1486_p5) target bundleno = 276 (0x114), region = 116  ;;  %690 = vst.msk [vmem:[#allocation2] sm:$0x3] (!%p1486_p5), %vm689_vm0, %v688_v0  ;;  %692 = vst.msk [vmem:[#allocation3] sm:$0x3] (!%p1486_p5), %vm689_vm0, %v691_v1  ;;  %vm696_vm2 = vcmask (!%p1486_p5), 58368  }
 0x10e   : > { %v693_v2 = vld [vmem:[#allocation6] sm:$0x3] (!%p1486_p5)  ;;  %v2143_v3 = vmov (!%p1486_p5), 1.0  }
 0x10f   : > { %695 = vst.msk [vmem:[#allocation5] sm:$0x3] (!%p1486_p5), %vm694_vm1, %v693_v2 }
 0x110   : > { %697 = vst.msk [vmem:[#allocation4] sm:$0x3] (!%p1486_p5), %vm696_vm2, %v2143_v3 }
 0x114 PF: > { %v1723_v4 = vld [vmem:[%s2726_s6] sm:$0xff]   ;;  %v2144_v5 = vmov 0.0   ;;  %vm2145_vm3 = vmmov 0   ;;  %v1725_v7 = vld [vmem:[%s2726_s6 + $0x8] sm:$0xff]   ;;  %vm776_vm4 = vcmask 130048   ;;  %vm726_vm5 = vcmask 261120  }
 0x115   : > { %1539 = vmatprep.subr.bf16.mxu0 %v2144_v5  ;;  %1547 = vmatprep.subr.bf16.mxu1 %v2144_v5  ;;  %v1724_v6 = vld [vmem:[#allocation14] sm:$0xff]   ;;  %v1492_v16 = vld [vmem:[#allocation15] ss:$0 sm:$0xff]  ;;  %s2146_s26 = smov 64   ;;  %s2147_s16 = smov 32   ;;  %v1726_v35 = vld [vmem:[#allocation17] sm:$0xff]   ;;  %v930_v46 = vlaneseq }
 0x116   : > { %1540 = vmatpush3.bf16.msra.mxu0 %v1723_v4  ;;  %1549 = vmatprep.mubr.msk.bf16.mxu1 %vm2145_vm3, %v2144_v5  ;;  %v698_v8 = vld [vmem:[#allocation5] sm:$0x3]  ;;  %v699_v9 = vld [vmem:[#allocation2] sm:$0x3]  ;;  %v700_v24 = vld [vmem:[#allocation3] sm:$0x3] }
 0x117   : > { %1548 = vmatpush3.bf16.msra.mxu1 %v1724_v6  ;;  %1541 = vmatprep.subr.bf16.mxu0 %v2144_v5  ;;  %v706_v10 = vpack.c.bf16 %v698_v8, %v698_v8  ;;  %v709_v11 = vpack.c.bf16 %v699_v9, %v699_v9  ;;  %v1727_v36 = vld [vmem:[#allocation20] sm:$0xff]   ;;  %v1728_v37 = vld [vmem:[#allocation17 + $0x8] sm:$0xff]   ;;  %v1729_v38 = vld [vmem:[#allocation20 + $0x8] sm:$0xff]   ;;  %v2148_v44 = vmov 1966171168   ;;  %v2568_v48 = vshrl.u32 %v930_v46, 7 }
 0x118   : > { %1543 = vmatprep.mubr.msk.bf16.mxu0 %vm2145_vm3, %v2144_v5  ;;  %1553 = vmatprep.subr.bf16.mxu1 %v2144_v5  ;;  %v928_v45 = vunpack.c.l.s4 %v2148_v44  ;;  %v1494_v49 = vld [vmem:[#allocation18] ss:$0 sm:$0xff]  ;;  %v2573_v56 = vld [vmem:[#allocation11] sm:$0xff]   ;;  %v1498_v9 = vld [vmem:[%s2730_s10] ss:$0 sm:$0xff]  ;;  %vm991_vm6 = vcmask 1041409  }
 0x119   : > { %v2576_v60 = vsub.s32 0, %v2568_v48  ;;  %v1519_v63 = vunpack.c.l.bf16 %v2573_v56  ;;  %v1520_v2 = vunpack.c.h.bf16 %v2573_v56  ;;  %vm995_vm8 = vcmask 58368   ;;  %s1507_s19 = sshll.u32 %s2122_s21, 1  ;;  %s2773_s15 = sld [smem:[#allocation37_spill]] }
 0x11a   : > { %1542 = vmatpush3.bf16.msra.mxu0 %v1725_v7  ;;  %1550 = vmatmul.mubr.msk.bf16.vlgmr.msra.gmra.mrb[0].mxu1 %vm776_vm4, %v706_v10  ;;  %v929_v47 = vunpack.c.0.s8 %v928_v45  ;;  %s1227_s23 = scalar_lea.vmem [#allocation21], %s1507_s19  ;;  %vm1229_vm11 = vcmask 254976   ;;  %s2149_s28 = smov 96   ;;  %vm1243_vm13 = vcmask 123904  }
 0x11b   : > { %1561 = vmatprep.subr.bf16.mxu0 %v2144_v5  ;;  %1557 = vmatprep.mubr.msk.bf16.mxu1 %vm2145_vm3, %v2144_v5  ;;  %p1508_p3 = scmp.ne.s32.totalorder %s2122_s21, 1 }
 0x11c   : > { %1554 = vmatpush3.bf16.msra.mxu1 %v1726_v35  ;;  %v932_v50 = vsub.s32 %v929_v47, %v2568_v48 }
 0x11d   : > { %1544 = vmatmul.mubr.msk.bf16.vlgmr.msra.gmra.mrb[0].mxu0 %vm726_vm5, %v709_v11  ;;  %1555 = vmatprep.subr.bf16.mxu1 %v2144_v5 }
 0x11e   : > { %1565 = vmatprep.mubr.msk.bf16.mxu0 %vm2145_vm3, %v2144_v5  ;;  %1562 = vmatpush3.bf16.msra.mxu0 %v1727_v36 }
 0x11f   : > { %1563 = vmatprep.subr.bf16.mxu0 %v2144_v5 }
 0x120   : > { %1556 = vmatpush3.bf16.msra.mxu1 %v1728_v37 }
 0x121   : > { %1569 = vmatprep.subr.bf16.mxu1 %v2144_v5 }
 0x122   : > { %1564 = vmatpush3.bf16.msra.mxu0 %v1729_v38  ;;  %v1730_v38 = vld [vmem:[%s2731_s11] sm:$0xff]  }
 0x1ed   : > { %v814_v12 = vpop.f32.mrb[0].mxu1 }
 0x1ee   : > { %v1551_v13 = vpop.f32.mrb[1].mxu1 }
 0x1ef   : > { %v817_v14 = vpop.f32.mrb[2].mxu1 }
 0x1f0   : > { %v764_v15 = vpop.f32.mrb[0].mxu0  ;;  %v1552_v17 = vpop.f32.mrb[3].mxu1 }
 0x1f1   : > { %v815_v18 = vadd.f32 %v814_v12, %v764_v15  ;;  %v1545_v19 = vpop.f32.mrb[1].mxu0 }
 0x1f2   : > { %v767_v20 = vpop.f32.mrb[2].mxu0  ;;  %v2593_v19 = vld [vmem:[#allocation4] sm:$0x3] }
 0x1f3   : > { %v827_v21 = vadd.f32 %v1492_v16, %v815_v18  ;;  %v1546_v22 = vpop.f32.mrb[3].mxu0  ;;  %v2589_v16 = vand.u32 127, %v930_v46  ;;  %vm978_vm7 = vcmp.gt.f32.partialorder %v2593_v19, 0.0 }
 0x1f5   : > { %1732 = vtanh.f32 %v827_v21  ;;  %v1493_v25 = vmul.f32 -1.442695, %v827_v21  ;;  %v985_v17 = vsub.s32 %v2589_v16, %v2568_v48 }
 0x1f7   : > { %1734 = vpow2.f32 %v1493_v25 }
 0x1ff   : > { %v1733_v23 = vpop.eup %1732 }
 0x200   : > { %841 = vrot.lane.b32.xlu0 %v1733_v23, %s2146_s26 }
 0x201   : > { %v1735_v26 = vpop.eup %1734 }
 0x202   : > { %v831_v27 = vadd.f32 1.0, %v1735_v26 }
 0x204   : > { %836 = vrot.lane.b32.xlu0 %v700_v24, %s2147_s16  ;;  %1736 = vrcp.f32 %v831_v27 }
 0x20e   : > { %v1737_v28 = vpop.eup %1736 }
 0x272   : > { %v842_v29 = vpop.permute.xlu0 %841 }
 0x273   : > { %v844_v30 = vmul.f32 %v1737_v28, %v842_v29 }
 0x275   : > { %846 = vrot.lane.b32.xlu1 %v844_v30, %s2147_s16 }
 0x276   : > { %v837_v31 = vpop.permute.xlu0 %836 }
 0x277   : > { %v839_v32 = vmul.f32 %v1737_v28, %v837_v31 }
 0x2e7   : > { %v847_v33 = vpop.permute.xlu1 %846 }
 0x2e8   : > { %v2556_v34 = vadd.f32 %v847_v33, %v839_v32  ;;  %v1016_v32 = vsub.s32 1, %v2568_v48 }
 0x2ea   : > { %1738 = vtanh.f32 %v2556_v34 }
 0x2f4   : > { %v1739_v39 = vpop.eup %1738 }
 0x2f5   : > { %852 = vrot.lane.b32.xlu1 %v1739_v39, %s2146_s26  ;;  %v1731_v39 = vld [vmem:[%s2731_s11 + $0x8] sm:$0xff]  }
 0x367   : > { %v853_v40 = vpop.permute.xlu1 %852 }
 0x368   : > { %v855_v41 = vmul.f32 %v1737_v28, %v853_v40 }
 0x36a   : > { %v856_v42 = vpack.c.bf16 %v855_v41, %v855_v41 }
 0x36c   : > { %869 = vrot.lane.b32.xlu0 %v856_v42, %s2147_s16 }
 0x3de   : > { %v870_v43 = vpop.permute.xlu0 %869 }
 0x3df   : > { %1558 = vmatmul.mubr.msk.bf16.vlgmr.msra.gmra.mrb[4].mxu1 %vm726_vm5, %v870_v43  ;;  %1566 = vmatmul.mubr.msk.bf16.vlgmr.msra.gmra.mrb[4].mxu0 %vm726_vm5, %v870_v43 }
 0x3e0   : > { %1573 = vmatprep.mubr.msk.bf16.mxu1 %vm2145_vm3, %v2144_v5  ;;  %1570 = vmatpush3.bf16.msra.mxu1 %v1730_v38 }
 0x3e1   : > { %1571 = vmatprep.subr.bf16.mxu1 %v2144_v5 }
 0x3e4   : > { %1572 = vmatpush3.bf16.msra.mxu1 %v1731_v39 }
 0x4b2   : > { %v920_v51 = vpop.f32.mrb[4].mxu1  ;;  %v2571_v52 = vpop.f32.mrb[4].mxu0 }
 0x4b3   : > { %v921_v53 = vadd.f32 %v1494_v49, %v920_v51  ;;  %v1559_v54 = vpop.f32.mrb[5].mxu1  ;;  %v1567_v55 = vpop.f32.mrb[5].mxu0 }
 0x4b4   : > { %v923_v57 = vpop.f32.mrb[6].mxu1  ;;  %v1096_v58 = vpop.f32.mrb[6].mxu0 }
 0x4b5   : > { %v933_v59 = vrot.slane %v921_v53, %v932_v50  ;;  %v1560_v61 = vpop.f32.mrb[7].mxu1  ;;  %v1568_v62 = vpop.f32.mrb[7].mxu0 }
 0x4b7   : > { %v934_v0 = vcombine.high %v933_v59, %v933_v59  ;;  %v941_v1 = vrot.slane %v933_v59, %v932_v50 }
 0x4b9   : > { %v948_v3 = vrot.slane %v934_v0, %v932_v50  ;;  %v952_v4 = vrot.slane %v941_v1, %v2576_v60 }
 0x4bb   : > { %v956_v6 = vrot.slane %v948_v3, %v2576_v60  ;;  %v959_v7 = vadd.f32 %v1519_v63, %v952_v4 }
 0x4bd   : > { %v960_v8 = vadd.f32 %v1520_v2, %v956_v6  ;;  %1740 = vtanh.f32 %v959_v7 }
 0x4bf   : > { %1742 = vtanh.f32 %v960_v8 }
 0x4c7   : > { %v1741_v10 = vpop.eup %1740 }
 0x4c8   : > { %v970_v11 = vmul.f32 %v1741_v10, %v1498_v9 }
 0x4c9   : > { %v1743_v12 = vpop.eup %1742 }
 0x4ca   : > { %v972_v13 = vsel %vm726_vm5, %v970_v11, 0.0  ;;  %v971_v14 = vmul.f32 %v1743_v12, %v1498_v9 }
 0x4cb   : > { %973 = vadd.xlane.f32.xlu1 %v972_v13 }
 0x4cc   : > { %v975_v15 = vsel %vm726_vm5, %v971_v14, 0.0 }
 0x4cd   : > { %976 = vadd.xlane.f32.xlu0 %v975_v15  ;;  %v1505_v15 = vld [vmem:[%s2773_s15] ss:$0 sm:$0xff] }
 0x558   : > { %v974_v18 = vpop.xlane.xlu1 %973 }
 0x559   : > { %v986_v21 = vrot.slane %v974_v18, %v985_v17 }
 0x55a   : > { %v977_v20 = vpop.xlane.xlu0 %976 }
 0x55b   : > { %v990_v22 = vrot.slane %v977_v20, %v985_v17 }
 0x55d   : > { %v992_v23 = vsel %vm991_vm6, %v990_v22, %v986_v21 }
 0x55e   : > { %v994_v24 = vsel %vm978_vm7, %v992_v23, -inf }
 0x55f   : > { %v996_v25 = vsel %vm995_vm8, %v994_v24, -inf }
 0x560   : > { %997 = vmax.xlane.f32.xlu0 %v996_v25 }
 0x5ed   : > { %v998_v26 = vpop.xlane.xlu0 %997 }
 0x5ee   : > { %v999_v27 = vsub.f32 %v994_v24, %v998_v26 }
 0x5f0   : > { %v1000_v28 = vmul.f32 1.442695, %v999_v27 }
 0x5f2   : > { %1744 = vpow2.f32 %v1000_v28 }
 0x5fc   : > { %v1745_v29 = vpop.eup %1744 }
 0x5fd   : > { %v1002_v30 = vsel %vm995_vm8, %v1745_v29, 0.0 }
 0x5fe   : > { %1003 = vadd.xlane.f32.xlu1 %v1002_v30 }
 0x68b   : > { %v1004_v31 = vpop.xlane.xlu1 %1003 }
 0x68c   : > { %1746 = vrcp.f32 %v1004_v31 }
 0x696   : > { %v1747_v33 = vpop.eup %1746 }
 0x697   : > { %v1006_v35 = vmul.f32 %v1747_v33, %v1745_v29 }
 0x699   : > { %1228 = vst.msk [vmem:[%s1227_s23] sm:$0x3] %vm995_vm8, %v1006_v35  ;;  %v1017_v36 = vrot.slane %v1006_v35, %v1016_v32  ;;  %v1010_v37 = vrot.slane %v1006_v35, %v2576_v60  ;;  %v1169_v40 = vsel %vm995_vm8, %v1006_v35, -inf }
 0x69b   : > { %1019 = vbcast.lane.b32.xlu1 %v1017_v36, 256  ;;  %1012 = vbcast.lane.b32.xlu0 %v1010_v37, 256 }
 0x6bf   : > { %1170 = vmax.xlane.f32.xlu1 %v1169_v40 }
 0x70d   : > { %v1020_v41 = vpop.permute.xlu1 %1019  ;;  %v1013_v42 = vpop.permute.xlu0 %1012 }
 0x70e   : > { %v1022_v43 = vmul.f32 %v1520_v2, %v1020_v41  ;;  %v1021_v44 = vmul.f32 %v1519_v63, %v1013_v42 }
 0x710   : > { %v1030_v45 = vsel %vm726_vm5, %v1022_v43, 0.0  ;;  %v1023_v46 = vsel %vm726_vm5, %v1021_v44, 0.0 }
 0x711   : > { %v1031_v47 = vrot.slane %v1030_v45, 4  ;;  %v1024_v49 = vrot.slane %v1023_v46, 4 }
 0x713   : > { %v1032_v50 = vadd.f32 %v1031_v47, %v1030_v45  ;;  %v1025_v51 = vadd.f32 %v1024_v49, %v1023_v46 }
 0x715   : > { %v1033_v53 = vrot.slane %v1032_v50, 2  ;;  %v1026_v54 = vrot.slane %v1025_v51, 2 }
 0x717   : > { %v1034_v55 = vadd.f32 %v1033_v53, %v1032_v50  ;;  %v1027_v57 = vadd.f32 %v1026_v54, %v1025_v51 }
 0x719   : > { %v1035_v58 = vrot.slane %v1034_v55, 1  ;;  %v1028_v59 = vrot.slane %v1027_v57, 1 }
 0x71b   : > { %v1036_v61 = vadd.f32 %v1035_v58, %v1034_v55  ;;  %v1029_v62 = vadd.f32 %v1028_v59, %v1027_v57 }
 0x71d   : > { %v1038_v0 = vpack.c.bf16 %v1036_v61, %v1036_v61  ;;  %v1037_v1 = vpack.c.bf16 %v1029_v62, %v1029_v62 }
 0x71f   : > { %v1102_v56 = vunpack.c.l.b16 %v1038_v0  ;;  %v1101_v63 = vunpack.c.l.b16 %v1037_v1 }
 0x721   : > { %v1103_v2 = vsel %vm991_vm6, %v1102_v56, %v1101_v63 }
 0x722   : > { %v1104_v3 = vpack.c.b16 %v1103_v2, %v1103_v2 }
 0x724   : > { %1574 = vmatmul.mubr.msk.bf16.vlgmr.msra.gmra.mrb[8].mxu1 %vm726_vm5, %v1104_v3 }
 0x74c   : > { %v1171_v4 = vpop.xlane.xlu1 %1170 }
 0x74d   : > { %vm1172_vm9 = vcmp.eq.f32.partialorder %v1006_v35, %v1171_v4  ;;  %v1522_v35 = vld [vmem:[#allocation12] sm:$0xff]  }
 0x74e   : > { %v1173_v6 = vsel %vm1172_vm9, %v2589_v16, 8  ;;  %v1524_v36 = vunpack.c.h.bf16 %v1522_v35 }
 0x74f   : > { %v1174_v7 = vsel %vm995_vm8, %v1173_v6, 2147483647 }
 0x750   : > { %v1176_v8 = vshra.s32 %v1174_v7, 16  ;;  %v1175_v10 = vand.u32 65535, %v1174_v7 }
 0x752   : > { %v1178_v9 = vcvt.s32.f32 %v1176_v8  ;;  %v1177_v12 = vcvt.s32.f32 %v1175_v10 }
 0x754   : > { %1179 = vmin.xlane.f32.xlu0 %v1178_v9 }
 0x7e1   : > { %v1180_v11 = vpop.xlane.xlu0 %1179 }
 0x7e2   : > { %vm1181_vm10 = vcmp.eq.f32.partialorder %v1178_v9, %v1180_v11  ;;  %v1186_v24 = vcvt.f32.s32 %v1180_v11 }
 0x7e3   : > { %v1182_v13 = vsel %vm1181_vm10, %v1177_v12, inf }
 0x7e4   : > { %1183 = vmin.xlane.f32.xlu0 %v1182_v13  ;;  %v1187_v26 = vshll.u32 %v1186_v24, 16 }
 0x7f7   : > { %v1154_v14 = vpop.f32.mrb[8].mxu1 }
 0x7f8   : > { %v1155_v17 = vadd.f32 %v1154_v14, %v2571_v52  ;;  %v1575_v18 = vpop.f32.mrb[9].mxu1 }
 0x7f9   : > { %v1157_v20 = vpop.f32.mrb[10].mxu1 }
 0x7fa   : > { %v1167_v21 = vadd.f32 %v1505_v15, %v1155_v17  ;;  %v1576_v22 = vpop.f32.mrb[11].mxu1 }
 0x7fc   : > { %1748 = vtanh.f32 %v1167_v21 }
 0x806   : > { %v1749_v23 = vpop.eup %1748 }
 0x807   : > { %1230 = vst.msk [vmem:[#allocation2] sm:$0x3] %vm1229_vm11, %v1749_v23  ;;  %1249 = vst.msk [vmem:[#allocation22] sm:$0x3] (!%p1508_p3), %vm1229_vm11, %v1749_v23 }
 0x871   : > { %v1184_v25 = vpop.xlane.xlu0 %1183 }
 0x872   : > { %v1185_v27 = vcvt.f32.s32 %v1184_v25 }
 0x874   : > { %v1188_v28 = vadd.s32 %v1187_v26, %v1185_v27 }
 0x876   : > { %vm1189_vm12 = vcmp.eq.s32.totalorder %v2589_v16, %v1188_v28  ;;  %v1523_v16 = vunpack.c.l.bf16 %v1522_v35 }
 0x877   : > { %v1506_v29 = vsel %vm1189_vm12, 1.0, %v2144_v5 }
 0x878   : > { %v1202_v52 = vrot.slane %v1506_v29, %v1016_v32  ;;  %v1236_v30 = vsub.f32 1.0, %v1506_v29  ;;  %v1195_v31 = vrot.slane %v1506_v29, %v2576_v60 }
 0x87a   : > { %v1237_v33 = vmul.f32 %v1236_v30, %v2593_v19  ;;  %1204 = vbcast.lane.b32.xlu0 %v1202_v52, 256  ;;  %1197 = vbcast.lane.b32.xlu1 %v1195_v31, 256 }
 0x87c   : > { %1238 = vst.msk [vmem:[#allocation4] sm:$0x3] %vm995_vm8, %v1237_v33 }
 0x87e   : > { %1232 = vrot.lane.b32.xlu1 %v2556_v34, %s2149_s28 }
 0x8ec   : > { %v1205_v37 = vpop.permute.xlu0 %1204  ;;  %v1198_v5 = vpop.permute.xlu1 %1197 }
 0x8ed   : > { %v1211_v38 = vmul.f32 %v1524_v36, %v1205_v37  ;;  %v1210_v48 = vmul.f32 %v1523_v16, %v1198_v5 }
 0x8ef   : > { %v1219_v32 = vsel %vm776_vm4, %v1211_v38, 0.0  ;;  %v1212_v60 = vsel %vm776_vm4, %v1210_v48, 0.0 }
 0x8f0   : > { %v1220_v39 = vrot.slane %v1219_v32, 4  ;;  %v1213_v19 = vrot.slane %v1212_v60, 4  ;;  %v1233_v40 = vpop.permute.xlu1 %1232 }
 0x8f1   : > { %1235 = vst.msk [vmem:[#allocation3] sm:$0x3] %vm1229_vm11, %v1233_v40  ;;  %1250 = vst.msk [vmem:[#allocation24] sm:$0x3] (!%p1508_p3), %vm1229_vm11, %v1233_v40 }
 0x8f2   : > { %v1221_v41 = vadd.f32 %v1220_v39, %v1219_v32  ;;  %v1214_v42 = vadd.f32 %v1213_v19, %v1212_v60 }
 0x8f4   : > { %v1222_v43 = vrot.slane %v1221_v41, 2  ;;  %v1215_v34 = vrot.slane %v1214_v42, 2 }
 0x8f6   : > { %v1223_v44 = vadd.f32 %v1222_v43, %v1221_v41  ;;  %v1216_v45 = vadd.f32 %v1215_v34, %v1214_v42 }
 0x8f7   : > { %1248 = sbr.rel (%p1508_p3) target bundleno = 2302 (0x8fe), region = 120 }
 0x8f8   : > { %v1224_v46 = vrot.slane %v1223_v44, 1  ;;  %v1217_v47 = vrot.slane %v1216_v45, 1 }
 0x8fa   : > { %v1225_v49 = vadd.f32 %v1224_v46, %v1223_v44  ;;  %v1218_v50 = vadd.f32 %v1217_v47, %v1216_v45 }
 0x8fc   : > { %v1241_v51 = vsel %vm991_vm6, %v1225_v49, %v1218_v50 }
 0x8fd   : > { %1244 = vst.msk [vmem:[#allocation5] sm:$0x3] %vm1243_vm13, %v1241_v51 }
 0x8fe PF: > { %s2774_s27 = sld [smem:[#allocation32_spill]]  ;;  %s2150_s13 = smov [#allocation22]  }
 0x8ff   : > { %s1275_s26 = sshll.u32 %s2150_s13, 4  ;;  %s1276_s26 = int_to_ptr.vmem [resolvable:$true] %s1275_s26 }
 0x900   : > { %s2002_s2 = scalar_lea.vmem %s1276_s26, 32  ;;  %p2009_p8 = scmp.lt.s32.totalorder %s1276_s26, %s1276_s26 }
 0x901   : > { %p2003_p1 = scmp.ne.s32.totalorder %s1276_s26, %s2002_s2  ;;  %p2010_p9 = scmp.lt.s32.totalorder %s2002_s2, %s2002_s2 }
 0x903   : > { %p2011_p10 = por %p2010_p9, %p2009_p8 }
 0x904   : > { %s2775_s0 = sadd.s32 4294967295, %s2774_s27  }
 0x905   : > { %p2643_p0 = scmp.eq.s32.totalorder %s2775_s0, 1 }
 0x907   : > { %p2004_p4 = pnand %p2003_p1, %p2643_p0 }
 0x909   : > { %p2005_p6 = pneg %p2004_p4 }
 0x90b   : > { %p2012_p11 = pnand %p2011_p10, %p2005_p6 }
 0x90d   : > { %2015 = shalt.err (!%p2012_p11)
}
 0x90e   : > { %s2777_s19 = sld [smem:[#allocation39_spill]] }
 0x914   : > { %s2016_s23 = scalar_lea.hbm %s2777_s19, 32 }
 0x915   : > { %p2017_p12 = scmp.ne.s32.totalorder %s2777_s19, %s2016_s23  ;;  %p2022_p7 = scmp.lt.u32.totalorder %s2016_s23, %s2777_s19 }
 0x917   : > { %p2018_p2 = pnand %p2017_p12, %p2643_p0 }
 0x919   : > { %p2019_p13 = pneg %p2018_p2 }
 0x91b   : > { %p2024_p5 = pnand %p2022_p7, %p2019_p13 }
 0x91d   : > { %2027 = shalt.err (!%p2024_p5)
}
 0x91e   : > { %1616 = dma.vmem_to_hbm [thread:$0]  (%p2643_p0), %s1276_s26, 32, %s2777_s19, [#allocation23]  }
 0x91f   : > { %s2151_s15 = smov [#allocation21]  }
 0x920   : > { %s1259_s28 = sshll.u32 %s2151_s15, 4  ;;  %s1260_s28 = int_to_ptr.vmem [resolvable:$true] %s1259_s28 }
 0x921   : > { %s2028_s27 = scalar_lea.vmem %s1260_s28, 64  ;;  %p2035_p6 = scmp.lt.s32.totalorder %s1260_s28, %s1260_s28 }
 0x922   : > { %p2029_p3 = scmp.ne.s32.totalorder %s1260_s28, %s2028_s27  ;;  %p2036_p8 = scmp.lt.s32.totalorder %s2028_s27, %s2028_s27 }
 0x924   : > { %p2030_p1 = pnand %p2029_p3, %p2643_p0  ;;  %p2037_p9 = por %p2036_p8, %p2035_p6 }
 0x926   : > { %p2031_p4 = pneg %p2030_p1 }
 0x928   : > { %p2038_p10 = pnand %p2037_p9, %p2031_p4 }
 0x92a   : > { %2041 = shalt.err (!%p2038_p10)
}
 0x92b   : > { %s2778_s2 = sld [smem:[#allocation38_spill]] }
 0x931   : > { %s2042_s21 = scalar_lea.hbm %s2778_s2, 64 }
 0x932   : > { %p2043_p11 = scmp.ne.s32.totalorder %s2778_s2, %s2042_s21  ;;  %p2048_p13 = scmp.lt.u32.totalorder %s2042_s21, %s2778_s2 }
 0x934   : > { %p2044_p12 = pnand %p2043_p11, %p2643_p0 }
 0x936   : > { %p2045_p2 = pneg %p2044_p12 }
 0x938   : > { %p2050_p7 = pnand %p2048_p13, %p2045_p2 }
 0x93a   : > { %2053 = shalt.err (!%p2050_p7)
}
 0x93b   : > { %s2152_s29 = smov 2   ;;  %s2153_s14 = smov [#allocation24]  }
 0x93c   : > { %1614 = dma.vmem_to_hbm [thread:$0]  (%p2643_p0), %s1260_s28, 64, %s2778_s2, [#allocation8], %s2147_s16, %s2147_s16, %s2152_s29  }
 0x93d   : > { %s1288_s3 = sshll.u32 %s2153_s14, 4  ;;  %s1289_s3 = int_to_ptr.vmem [resolvable:$true] %s1288_s3 }
 0x93e   : > { %s2054_s15 = scalar_lea.vmem %s1289_s3, 32  ;;  %p2061_p4 = scmp.lt.s32.totalorder %s1289_s3, %s1289_s3 }
 0x93f   : > { %p2055_p5 = scmp.ne.s32.totalorder %s1289_s3, %s2054_s15  ;;  %p2062_p6 = scmp.lt.s32.totalorder %s2054_s15, %s2054_s15 }
 0x941   : > { %p2056_p3 = pnand %p2055_p5, %p2643_p0  ;;  %p2063_p8 = por %p2062_p6, %p2061_p4 }
 0x943   : > { %p2057_p1 = pneg %p2056_p3 }
 0x945   : > { %p2064_p9 = pnand %p2063_p8, %p2057_p1 }
 0x947   : > { %2067 = shalt.err (!%p2064_p9)
}
 0x948   : > { %s2779_s13 = sld [smem:[#allocation40_spill]] }
 0x94e   : > { %s2068_s21 = scalar_lea.hbm %s2779_s13, 32 }
 0x94f   : > { %p2069_p10 = scmp.ne.s32.totalorder %s2779_s13, %s2068_s21  ;;  %p2074_p2 = scmp.lt.u32.totalorder %s2068_s21, %s2779_s13 }
 0x951   : > { %p2070_p11 = pnand %p2069_p10, %p2643_p0 }
 0x953   : > { %p2071_p12 = pneg %p2070_p11 }
 0x955   : > { %p2076_p13 = pnand %p2074_p2, %p2071_p12 }
 0x957   : > { %2079 = shalt.err (!%p2076_p13)
}
 0x958   : > { %1618 = dma.vmem_to_hbm [thread:$0]  (%p2643_p0), %s1289_s3, 32, %s2779_s13, [#allocation23]  }
 0x959   : > { %2113 = dma.done.wait (%p2643_p0), [#allocation8], 64  }
 0x95a   : > { %2115 = vsyncadd (%p2643_p0), [#allocation8], 4294967232 }
 0x95b   : > { %2117 = dma.done.wait (%p2643_p0), [#allocation23], 64  }
 0x95c   : > { %2119 = vsyncadd (%p2643_p0), [#allocation23], 4294967232 }
 0x95d PF: > { %s2780_s29 = sld [smem:[#allocation32_spill]]  ;;  %s2781_s21 = smov %s2126_s22 }
 0x95e   : > { %s2782_s22 = smov %s2784_s24 }
 0x963   : > { %s34_s23 = sadd.s32 1, %s2780_s29  }
 0x964   : > { %p31_p7 = scmp.ge.s32.totalorder %s34_s23, 4  }
 0x966   :  { %33 = sbr.rel (!%p31_p7) target bundleno = 17 (0x11), region = 172 }
 0x96d   :  { %1309 = vsyncpa [#allocation7], 1 }
 0x96e   :  { %1311 = vsyncpa [#allocation7 + $0x1], 1 }
 0x96f   :  { %1312 = vsyncpa [#allocation10], 1 }
 0x970   :  { %1313 = vsyncpa [#allocation13], 1 }
 0x971   :  { %1314 = vsyncpa [#allocation16], 1 }
 0x972   :  { %1315 = vsyncpa [#allocation19], 1 }
 0x973   :  { %1316 = vsyncpa [#allocation8], 1 }
 0x974   :  { %1318 = vsyncpa [#allocation8 + $0x1], 1 }
 0x975   :  { %1319 = vsyncpa [#allocation23], 1 }

</bundles_post_ra>
